<compile_context>
chip_gen: v6e
topology: v6e:2x2x1
jax: 0.10.0
libtpu: 0.0.40
codegen_flags: <defaults>
</compile_context>

<pallas_src>
import jax
import jax.numpy as jnp
from jax.experimental import pallas as pl
from jax.experimental.pallas import tpu as pltpu


LANE = 128      # lane width (last dim)
SUBLANE = 16    # bf16 sublane pack (second-to-last dim)


def _round_up(n, m):
    return ((n + m - 1) // m) * m


def weight_norm_dim_none(v, g):
    """PyTorch weight_norm with dim=None: W = g * v / ||v||_F (scalar g)."""
    return g * v / jnp.sqrt(jnp.sum(v * v))


def classifier_kernel(x_ref, w1_ref, b1_ref, w2_ref, b2_ref, o_ref):
    # First (weight-norm-folded) linear on the MXU, f32 accumulate.
    h = jnp.dot(x_ref[...], w1_ref[...], preferred_element_type=jnp.float32)
    h = jnp.maximum(h + b1_ref[...], 0.0)          # bias + ReLU (VPU)
    # TODO(synk): training-mode dropout (stateful PRNG masking) not implemented;
    # eval-mode dropout is the identity.
    logits = jnp.dot(h.astype(w2_ref.dtype), w2_ref[...],
                     preferred_element_type=jnp.float32)
    o_ref[...] = (logits + b2_ref[...]).astype(o_ref.dtype)


def simple_classifier_forward(x, w1, b1, w2, b2, *, block_rows=512):
    """Fused Linear -> ReLU -> (Dropout, eval) -> Linear.

    x:  [B, in_dim]
    w1: [in_dim, hid]   (weight_norm already folded, [in, out] layout)
    b1: [hid]
    w2: [hid, out]
    b2: [out]
    returns f32 [B, out]
    """
    B, in_dim = x.shape
    hid = w1.shape[1]
    out = w2.shape[1]

    # Lane-pad feature dims to 128: unmasked stores, full MXU columns.
    # Zero padding is exact (padded hidden units get zero weight & bias,
    # padded output columns are sliced off at the end).
    hid_p = _round_up(hid, LANE)
    out_p = _round_up(out, LANE)

    w1_p = jnp.zeros((in_dim, hid_p), jnp.bfloat16).at[:, :hid].set(
        w1.astype(jnp.bfloat16))
    b1_p = jnp.zeros((1, hid_p), jnp.float32).at[:, :hid].set(
        b1.reshape(1, hid).astype(jnp.float32))
    w2_p = jnp.zeros((hid_p, out_p), jnp.bfloat16).at[:hid, :out].set(
        w2.astype(jnp.bfloat16))
    b2_p = jnp.zeros((1, out_p), jnp.float32).at[:, :out].set(
        b2.reshape(1, out).astype(jnp.float32))

    # Batch tile: multiple of the bf16 sublane pack, capped by a VMEM budget
    # (double-buffered x/out tiles + resident weights + f32 intermediate).
    tb = _round_up(min(block_rows, _round_up(B, SUBLANE)), SUBLANE)

    def vmem_bytes(t):
        return (2 * (t * in_dim * 2 + t * out_p * 4)        # dbl-buffered x / out
                + in_dim * hid_p * 2 + hid_p * out_p * 2    # resident weights
                + hid_p * 4 + out_p * 4                     # resident biases
                + t * hid_p * 4)                            # f32 intermediate h

    VMEM_BUDGET = 32 * 1024 * 1024
    while vmem_bytes(tb) > VMEM_BUDGET and tb > SUBLANE:
        tb //= 2

    b_pad = _round_up(B, tb)
    x_p = jnp.zeros((b_pad, in_dim), jnp.bfloat16).at[:B, :].set(
        x.astype(jnp.bfloat16))

    grid = (b_pad // tb,)

    cost = pl.CostEstimate(
        flops=2 * b_pad * (in_dim * hid_p + hid_p * out_p),
        transcendentals=0,
        bytes_accessed=(x_p.size * 2 + w1_p.size * 2 + w2_p.size * 2
                        + b1_p.size * 4 + b2_p.size * 4 + b_pad * out_p * 4),
    )

    out_pad = pl.pallas_call(
        classifier_kernel,
        out_shape=jax.ShapeDtypeStruct((b_pad, out_p), jnp.float32),
        grid=grid,
        in_specs=[
            pl.BlockSpec((tb, in_dim), lambda i: (i, 0)),     # batch-tiled x
            pl.BlockSpec((in_dim, hid_p), lambda i: (0, 0)),  # resident W1
            pl.BlockSpec((1, hid_p), lambda i: (0, 0)),       # resident b1
            pl.BlockSpec((hid_p, out_p), lambda i: (0, 0)),   # resident W2
            pl.BlockSpec((1, out_p), lambda i: (0, 0)),       # resident b2
        ],
        out_specs=pl.BlockSpec((tb, out_p), lambda i: (i, 0)),
        compiler_params=pltpu.CompilerParams(
            dimension_semantics=("parallel",),      # megacore split on v7x
            vmem_limit_bytes=48 * 1024 * 1024,      # headroom under v7x 64 MiB
        ),
        cost_estimate=cost,
    )(x_p, w1_p, b1_p, w2_p, b2_p)

    return out_pad[:B, :out]


if __name__ == "__main__":
    key = jax.random.PRNGKey(0)
    B, in_dim, hid_dim, out_dim = 8, 64, 32, 16
    dropout = 0.5  # identity at inference

    k = jax.random.split(key, 5)
    x = jax.random.normal(k[0], (B, in_dim), dtype=jnp.float32)

    # Parameters: v1/v2 in PyTorch Linear layout [out_features, in_features],
    # g is the scalar weight_norm gain.
    v1 = jax.random.normal(k[1], (hid_dim, in_dim), dtype=jnp.float32) * 0.1
    g1 = jnp.float32(1.5)
    b1 = jax.random.normal(k[2], (hid_dim,), dtype=jnp.float32) * 0.1
    v2 = jax.random.normal(k[3], (out_dim, hid_dim), dtype=jnp.float32) * 0.1
    g2 = jnp.float32(0.8)
    b2 = jax.random.normal(k[4], (out_dim,), dtype=jnp.float32) * 0.1

    # Fold weight_norm and transpose to [in, out] for the x @ W layout.
    W1 = weight_norm_dim_none(v1, g1).T          # [in_dim, hid_dim]
    W2 = weight_norm_dim_none(v2, g2).T          # [hid_dim, out_dim]

    out = simple_classifier_forward(x, W1, b1, W2, b2)
    out = jax.block_until_ready(out)

    # Pure-JAX f32 reference; tolerance loosened for bf16 MXU operands.
    ref = jnp.maximum(x @ W1 + b1.reshape(1, -1), 0.0) @ W2 + b2.reshape(1, -1)
    assert out.shape == (B, out_dim)
    assert jnp.allclose(out, ref, atol=2e-2, rtol=2e-2), "mismatch vs reference"

    print("KERNEL_OK")
</pallas_src>

<mosaic_0001>
module attributes {stable_mosaic.version = 11 : i64} {
  func.func @classifier_kernel(%arg0: i32, %arg1: memref<16x64xbf16, #tpu.memory_space<vmem>>, %arg2: memref<64x128xbf16, #tpu.memory_space<vmem>>, %arg3: memref<1x128xf32, #tpu.memory_space<vmem>>, %arg4: memref<128x128xbf16, #tpu.memory_space<vmem>>, %arg5: memref<1x128xf32, #tpu.memory_space<vmem>>, %arg6: memref<16x128xf32, #tpu.memory_space<vmem>>) attributes {dimension_semantics = [#tpu.dimension_semantics<parallel>], iteration_bounds = array<i64: 1>, scalar_prefetch = 0 : i64, scratch_operands = 0 : i64, tpu.core_type = #tpu.core_type<tc>, window_params = [{transform_indices = @transform_0, window_bounds = array<i64: 16, 64>}, {pipeline_mode = #tpu.pipeline_mode<synchronous>, transform_indices = @transform_1, window_bounds = array<i64: 64, 128>}, {pipeline_mode = #tpu.pipeline_mode<synchronous>, transform_indices = @transform_2, window_bounds = array<i64: 1, 128>}, {pipeline_mode = #tpu.pipeline_mode<synchronous>, transform_indices = @transform_3, window_bounds = array<i64: 128, 128>}, {pipeline_mode = #tpu.pipeline_mode<synchronous>, transform_indices = @transform_4, window_bounds = array<i64: 1, 128>}, {transform_indices = @transform_5, window_bounds = array<i64: 16, 128>}]} {
    %c0 = arith.constant 0 : index
    %c0_0 = arith.constant 0 : index
    %0 = vector.load %arg1[%c0, %c0_0] : memref<16x64xbf16, #tpu.memory_space<vmem>>, vector<16x64xbf16>
    %c0_1 = arith.constant 0 : index
    %c0_2 = arith.constant 0 : index
    %1 = vector.load %arg2[%c0_1, %c0_2] : memref<64x128xbf16, #tpu.memory_space<vmem>>, vector<64x128xbf16>
    %cst = arith.constant dense<0.000000e+00> : vector<16x128xf32>
    %2 = tpu.matmul %0, %1, %cst {dimension_numbers = #tpu.dot_dimension_numbers<[1], [0], [0], [1], [0, 0, 1, 1], [], []>} : vector<16x64xbf16>, vector<64x128xbf16>, vector<16x128xf32> -> vector<16x128xf32>
    %c0_3 = arith.constant 0 : index
    %c0_4 = arith.constant 0 : index
    %3 = vector.load %arg3[%c0_3, %c0_4] : memref<1x128xf32, #tpu.memory_space<vmem>>, vector<1x128xf32>
    %4 = vector.broadcast %3 : vector<1x128xf32> to vector<16x128xf32>
    %5 = arith.addf %2, %4 : vector<16x128xf32>
    %cst_5 = arith.constant 0.000000e+00 : f32
    %6 = vector.broadcast %cst_5 : f32 to vector<16x128xf32>
    %7 = arith.maximumf %5, %6 : vector<16x128xf32>
    %8 = arith.truncf %7 : vector<16x128xf32> to vector<16x128xbf16>
    %c0_6 = arith.constant 0 : index
    %c0_7 = arith.constant 0 : index
    %9 = vector.load %arg4[%c0_6, %c0_7] : memref<128x128xbf16, #tpu.memory_space<vmem>>, vector<128x128xbf16>
    %cst_8 = arith.constant dense<0.000000e+00> : vector<16x128xf32>
    %10 = tpu.matmul %8, %9, %cst_8 {dimension_numbers = #tpu.dot_dimension_numbers<[1], [0], [0], [1], [0, 0, 1, 1], [], []>} : vector<16x128xbf16>, vector<128x128xbf16>, vector<16x128xf32> -> vector<16x128xf32>
    %c0_9 = arith.constant 0 : index
    %c0_10 = arith.constant 0 : index
    %11 = vector.load %arg5[%c0_9, %c0_10] : memref<1x128xf32, #tpu.memory_space<vmem>>, vector<1x128xf32>
    %12 = vector.broadcast %11 : vector<1x128xf32> to vector<16x128xf32>
    %13 = arith.addf %10, %12 : vector<16x128xf32>
    %c0_11 = arith.constant 0 : index
    %c0_12 = arith.constant 0 : index
    %14 = vector.load %arg6[%c0_11, %c0_12] : memref<16x128xf32, #tpu.memory_space<vmem>>, vector<16x128xf32>
    tpu.vector_store %arg6[%c0_11, %c0_12], %13 {strides = array<i32>} : memref<16x128xf32, #tpu.memory_space<vmem>>, vector<16x128xf32>,
    return
  }
  func.func @transform_0(%arg0: i32) -> (i32, i32) {
    %c0_i32 = arith.constant 0 : i32
    %c0_i32_0 = arith.constant 0 : i32
    return %arg0, %c0_i32 : i32, i32
  }
  func.func @transform_1(%arg0: i32) -> (i32, i32) {
    %c0_i32 = arith.constant 0 : i32
    %c0_i32_0 = arith.constant 0 : i32
    %c0_i32_1 = arith.constant 0 : i32
    return %c0_i32, %c0_i32_0 : i32, i32
  }
  func.func @transform_2(%arg0: i32) -> (i32, i32) {
    %c0_i32 = arith.constant 0 : i32
    %c0_i32_0 = arith.constant 0 : i32
    %c0_i32_1 = arith.constant 0 : i32
    return %c0_i32, %c0_i32_0 : i32, i32
  }
  func.func @transform_3(%arg0: i32) -> (i32, i32) {
    %c0_i32 = arith.constant 0 : i32
    %c0_i32_0 = arith.constant 0 : i32
    %c0_i32_1 = arith.constant 0 : i32
    return %c0_i32, %c0_i32_0 : i32, i32
  }
  func.func @transform_4(%arg0: i32) -> (i32, i32) {
    %c0_i32 = arith.constant 0 : i32
    %c0_i32_0 = arith.constant 0 : i32
    %c0_i32_1 = arith.constant 0 : i32
    return %c0_i32, %c0_i32_0 : i32, i32
  }
  func.func @transform_5(%arg0: i32) -> (i32, i32) {
    %c0_i32 = arith.constant 0 : i32
    %c0_i32_0 = arith.constant 0 : i32
    return %arg0, %c0_i32 : i32, i32
  }
}

</mosaic_0001>

<bundles_post_ra>
// kernel: tpu_custom_call.1
= control target key start
LH: loop header
LB: loop body
LE: loop exit
PB: predicated region body
PF: predicated region fallthrough
CT: control target
= control target key end

     0   :  { %10 = vsyncpa [#allocation3], 0  ;;  %s518_s0 = inlined_call_operand.hbm [shape: bf16[16,64], index: 0, kind: input, shape index: {}]   ;;  %s519_s1 = inlined_call_operand.hbm [shape: bf16[64,128], index: 1, kind: input, shape index: {}]   ;;  %s520_s2 = inlined_call_operand.vmem [shape: f32[1,128], index: 2, kind: input, shape index: {}]   ;;  %s521_s3 = inlined_call_operand.hbm [shape: bf16[128,128], index: 3, kind: input, shape index: {}]   ;;  %s522_s4 = inlined_call_operand.vmem [shape: f32[1,128], index: 4, kind: input, shape index: {}]   ;;  %s523_s5 = inlined_call_operand.hbm [shape: f32[16,128], index: 5, kind: output, shape index: {}]  }
   0x1   :  { %11 = vsyncpa [#allocation6], 0 }
   0x2   :  { %12 = vsyncpa [#allocation4], 0  ;;  %s460_s18 = smov [#allocation5]   ;;  %s461_s20 = smov [#allocation2]  }
   0x3   :  { %s30_s19 = sshll.u32 %s460_s18, 4  ;;  %s18_s21 = sshll.u32 %s461_s20, 4  ;;  %s31_s19 = int_to_ptr.vmem [resolvable:$true] %s30_s19  ;;  %s19_s21 = int_to_ptr.vmem [resolvable:$true] %s18_s21 }
   0x4   :  { %s382_s22 = scalar_lea.vmem %s31_s19, 512  ;;  %p387_p1 = scmp.lt.s32.totalorder %s31_s19, %s31_s19 }
   0x5   :  { %p383_p0 = scmp.ne.s32.totalorder %s31_s19, %s382_s22  ;;  %p388_p2 = scmp.lt.s32.totalorder %s382_s22, %s382_s22 }
   0x7   :  { %p389_p3 = por %p388_p2, %p387_p1 }
   0x9   :  { %p390_p4 = pnand %p389_p3, %p383_p0 }
   0xb   :  { %393 = shalt.err (!%p390_p4)
}
   0xc   :  { %s462_s23 = smov 64   ;;  %s463_s24 = smov 4  }
   0xd   :  { %36 = dma.hbm_to_vmem [thread:$0]  %s519_s1, 512, %s31_s19, [#allocation6], %s462_s23, %s462_s23, %s463_s24  }
   0xe   :  { %s402_s27 = scalar_lea.vmem %s19_s21, 128  ;;  %p407_p6 = scmp.lt.s32.totalorder %s19_s21, %s19_s21 }
   0xf   :  { %p403_p5 = scmp.ne.s32.totalorder %s19_s21, %s402_s27  ;;  %p408_p7 = scmp.lt.s32.totalorder %s402_s27, %s402_s27 }
  0x11   :  { %p409_p8 = por %p408_p7, %p407_p6 }
  0x13   :  { %p410_p9 = pnand %p409_p8, %p403_p5 }
  0x15   :  { %413 = shalt.err (!%p410_p9)
}
  0x16   :  { %24 = dma.hbm_to_vmem [thread:$0]  %s518_s0, 128, %s19_s21, [#allocation3], %s462_s23, %s462_s23, %s463_s24  }
  0x17   :  { %s464_s30 = smov [#allocation7]  }
  0x18   :  { %s44_s6 = sshll.u32 %s464_s30, 4  ;;  %s45_s6 = int_to_ptr.vmem [resolvable:$true] %s44_s6 }
  0x19   :  { %s422_s7 = scalar_lea.vmem %s45_s6, 1024  ;;  %p427_p11 = scmp.lt.s32.totalorder %s45_s6, %s45_s6 }
  0x1a   :  { %p423_p10 = scmp.ne.s32.totalorder %s45_s6, %s422_s7  ;;  %p428_p12 = scmp.lt.s32.totalorder %s422_s7, %s422_s7 }
  0x1c   :  { %p429_p13 = por %p428_p12, %p427_p11 }
  0x1e   :  { %p430_p0 = pnand %p429_p13, %p423_p10 }
  0x20   :  { %433 = shalt.err (!%p430_p0)
}
  0x21   :  { %50 = dma.hbm_to_vmem [thread:$0]  %s521_s3, 1024, %s45_s6, [#allocation6], %s462_s23, %s462_s23, %s463_s24  }
  0x22   :  { %454 = dma.done.wait [#allocation3], 128  }
  0x23   :  { %455 = vsyncadd [#allocation3], 4294967168 }
  0x24   :  { %456 = dma.done.wait [#allocation6], 1536  }
  0x25   :  { %457 = vsyncadd [#allocation6], 4294965760  ;;  %v465_v0 = vmov 0.0   ;;  %vm466_vm0 = vmmov 0   ;;  %v361_v1 = vld [vmem:[#allocation5 + $0x18] sm:$0xff]   ;;  %v362_v2 = vld [vmem:[#allocation5 + $0x10] sm:$0xff]  }
  0x26   :  { %319 = vmatprep.subr.bf16.mxu0 %v465_v0  ;;  %327 = vmatprep.mubr.msk.bf16.mxu0 %vm466_vm0, %v465_v0  ;;  %v366_v3 = vld [vmem:[#allocation7 + $0x38] sm:$0xff]   ;;  %v363_v4 = vld [vmem:[#allocation5 + $0x8] sm:$0xff]   ;;  %v367_v5 = vld [vmem:[#allocation7 + $0x30] sm:$0xff]   ;;  %vm109_vm1 = vcmask 523264   ;;  %s467_s11 = smov [#allocation8]  }
  0x27   :  { %331 = vmatprep.subr.bf16.mxu1 %v465_v0  ;;  %347 = vmatprep.mubr.msk.bf16.mxu1 %vm466_vm0, %v465_v0  ;;  %v364_v6 = vld [vmem:[#allocation5] sm:$0xff]   ;;  %v368_v7 = vld [vmem:[#allocation7 + $0x28] sm:$0xff]   ;;  %v365_v8 = vld [vmem:[#allocation2] sm:$0xff]   ;;  %s276_s12 = sshll.u32 %s467_s11, 4  ;;  %s277_s12 = int_to_ptr.vmem [resolvable:$true] %s276_s12 }
  0x28   :  { %320 = vmatpush3.bf16.msra.mxu0 %v361_v1  ;;  %332 = vmatpush3.bf16.msra.mxu1 %v366_v3  ;;  %v369_v9 = vld [vmem:[#allocation7 + $0x20] sm:$0xff]   ;;  %v370_v10 = vld [vmem:[#allocation7 + $0x18] sm:$0xff]   ;;  %v371_v11 = vld [vmem:[#allocation7 + $0x10] sm:$0xff]   ;;  %p439_p2 = scmp.lt.s32.totalorder %s277_s12, %s277_s12 }
  0x29   :  { %321 = vmatprep.subr.bf16.mxu0 %v465_v0  ;;  %333 = vmatprep.subr.bf16.mxu1 %v465_v0  ;;  %v372_v12 = vld [vmem:[#allocation7 + $0x8] sm:$0xff]   ;;  %v373_v13 = vld [vmem:[#allocation7] sm:$0xff]   ;;  %v289_v14 = vld [vmem:[%s520_s2] ss:$0 sm:$0xff]  ;;  %s434_s2 = scalar_lea.vmem %s277_s12, 256 }
  0x2a   :  { %v296_v24 = vld [vmem:[%s522_s4] ss:$0 sm:$0xff]  ;;  %p435_p1 = scmp.ne.s32.totalorder %s277_s12, %s434_s2  ;;  %p440_p3 = scmp.lt.s32.totalorder %s434_s2, %s434_s2 }
  0x2c   :  { %322 = vmatpush3.bf16.msra.mxu0 %v362_v2  ;;  %334 = vmatpush3.bf16.msra.mxu1 %v367_v5  ;;  %p441_p4 = por %p440_p3, %p439_p2 }
  0x2d   :  { %323 = vmatprep.subr.bf16.mxu0 %v465_v0  ;;  %335 = vmatprep.subr.bf16.mxu1 %v465_v0 }
  0x2e   :  { %p442_p5 = pnand %p441_p4, %p435_p1 }
  0x30   :  { %324 = vmatpush3.bf16.msra.mxu0 %v363_v4  ;;  %336 = vmatpush3.bf16.msra.mxu1 %v368_v7 }
  0x31   :  { %325 = vmatprep.subr.bf16.mxu0 %v465_v0  ;;  %337 = vmatprep.subr.bf16.mxu1 %v465_v0 }
  0x34   :  { %326 = vmatpush3.bf16.msra.mxu0 %v364_v6  ;;  %338 = vmatpush3.bf16.msra.mxu1 %v369_v9 }
  0x35   :  { %339 = vmatprep.subr.bf16.mxu1 %v465_v0 }
  0x37   :  { %328 = vmatmul.mubr.msk.bf16.vlgmr.msra.gmra.mxu0 %vm109_vm1, %v365_v8 }
  0x38   :  { %340 = vmatpush3.bf16.msra.mxu1 %v370_v10 }
  0x39   :  { %341 = vmatprep.subr.bf16.mxu1 %v465_v0 }
  0x3c   :  { %342 = vmatpush3.bf16.msra.mxu1 %v371_v11 }
  0x3d   :  { %343 = vmatprep.subr.bf16.mxu1 %v465_v0 }
  0x40   :  { %344 = vmatpush3.bf16.msra.mxu1 %v372_v12 }
  0x41   :  { %345 = vmatprep.subr.bf16.mxu1 %v465_v0 }
  0x44   :  { %346 = vmatpush3.bf16.msra.mxu1 %v373_v13 }
  0xf7   :  { %v147_v15 = vpop.f32.mrf.mxu0 }
  0xf8   :  { %v148_v17 = vadd.f32 %v289_v14, %v147_v15 }
  0xf9   :  { %v329_v16 = vpop.f32.mrf.mxu0 }
  0xfa   :  { %v154_v21 = vmax.f32 %v148_v17, 0.0 }
  0xfb   :  { %v150_v18 = vpop.f32.mrf.mxu0 }
  0xfc   :  { %v151_v19 = vadd.f32 %v289_v14, %v150_v18 }
  0xfd   :  { %v330_v20 = vpop.f32.mrf.mxu0 }
  0xfe   :  { %v155_v22 = vmax.f32 %v151_v19, 0.0 }
 0x100   :  { %v156_v23 = vpack.c.bf16 %v155_v22, %v154_v21 }
 0x102   :  { %348 = vmatmul.mubr.bf16.vlgmr.msra.gmra.mxu1 %v156_v23 }
 0x1c2   :  { %v262_v25 = vpop.f32.mrf.mxu1 }
 0x1c3   :  { %v263_v26 = vadd.f32 %v296_v24, %v262_v25 }
 0x1c4   :  { %v349_v27 = vpop.f32.mrf.mxu1 }
 0x1c5   :  { %269 = vst [vmem:[#allocation8] sm:$0xff] %v263_v26 }
 0x1c6   :  { %v265_v28 = vpop.f32.mrf.mxu1 }
 0x1c7   :  { %v266_v29 = vadd.f32 %v296_v24, %v265_v28 }
 0x1c8   :  { %v350_v30 = vpop.f32.mrf.mxu1 }
 0x1c9   :  { %270 = vst [vmem:[#allocation8 + $0x8] sm:$0xff] %v266_v29 }
 0x1ca   :  { %445 = shalt.err (!%p442_p5)
}
 0x1cb   :  { %s468_s13 = smov 128   ;;  %s469_s4 = smov 8  }
 0x1cc   :  { %282 = dma.vmem_to_hbm [thread:$0]  %s277_s12, 256, %s523_s5, [#allocation4], %s468_s13, %s468_s13, %s469_s4  }
 0x1cd   :  { %458 = dma.done.wait [#allocation4], 256  }
 0x1ce   :  { %459 = vsyncadd [#allocation4], 4294967040 }
 0x1cf   :  { %286 = vsyncpa [#allocation3], 1 }
 0x1d0   :  { %287 = vsyncpa [#allocation6], 1 }
 0x1d1   :  { %288 = vsyncpa [#allocation4], 1 }

</bundles_post_ra>
